<compile_context>
chip_gen: v6e
topology: v6e:2x2x1
jax: 0.10.0
libtpu: 0.0.40
codegen_flags: <defaults>
</compile_context>

<pallas_src>
import functools

import jax
import jax.numpy as jnp
from jax.experimental import pallas as pl
from jax.experimental.pallas import tpu as pltpu

LANE = 128       # lane-dense padded feature width (all dims <= 128 here)
BIAS_ROWS = 8    # six bias rows packed into one (8, 128) sublane-aligned tile


def ae1_kernel(x_ref,
               w1_ref, w2_ref, w3_ref, w4_ref, w5_ref, w6_ref,
               b_ref, out_ref):
    """One TILE_B x 128 activation tile through all six layers."""
    a = x_ref[...].astype(jnp.float32)

    def layer(a, w_ref, row, relu):
        y = jnp.dot(a, w_ref[...].astype(jnp.float32),
                    preferred_element_type=jnp.float32)
        y = y + b_ref[pl.ds(row, 1), :]          # (1, 128) broadcast over rows
        return jnp.maximum(y, 0.0) if relu else y

    # encoder1
    a = layer(a, w1_ref, 0, True)
    a = layer(a, w2_ref, 1, True)
    a = layer(a, w3_ref, 2, False)               # code: no activation
    # decoder1
    a = layer(a, w4_ref, 3, True)
    a = layer(a, w5_ref, 4, True)
    a = layer(a, w6_ref, 5, False)               # reconstruction: no activation

    out_ref[...] = a.astype(out_ref.dtype)


def _pad2(a, rows, cols):
    return jnp.pad(a, ((0, rows - a.shape[0]), (0, cols - a.shape[1])))


def _round_up(n, m):
    return ((n + m - 1) // m) * m


@functools.partial(jax.jit, static_argnames=("tile_b", "io_dtype"))
def ae1_forward(x, params, *, tile_b=512, io_dtype=jnp.float32):
    """x: (B, ae1_input) float32. params: list of 6 (W_t, b) with W_t (in, out).

    io_dtype: dtype used for the HBM<->VMEM activation/weight traffic
    (jnp.bfloat16 halves HBM bytes on v6e/v7x; compute stays f32 in-kernel).
    """
    B, D_in = x.shape
    assert D_in <= LANE

    # --- lane-dense padded parameters (done once per call under jit) --------
    w_pad = [_pad2(w, LANE, LANE).astype(io_dtype) for (w, _) in params]
    b_rows = [jnp.pad(b, (0, LANE - b.shape[0])) for (_, b) in params]
    b_rows += [jnp.zeros((LANE,), jnp.float32)] * (BIAS_ROWS - len(b_rows))
    b_packed = jnp.stack(b_rows).astype(jnp.float32)          # (8, 128), f32

    # --- batch tiling --------------------------------------------------------
    tb = min(tile_b, _round_up(max(B, 8), 8))     # >= 8 sublanes, <= tile_b
    b_pad = _round_up(B, tb)
    x_p = _pad2(x, b_pad, LANE).astype(io_dtype)
    grid = (b_pad // tb,)

    act_spec = pl.BlockSpec((tb, LANE), lambda i: (i, 0))
    # constant index_map => weights/biases stay resident in VMEM for the grid
    w_spec = pl.BlockSpec((LANE, LANE), lambda i: (0, 0))
    b_spec = pl.BlockSpec((BIAS_ROWS, LANE), lambda i: (0, 0))

    out = pl.pallas_call(
        ae1_kernel,
        out_shape=jax.ShapeDtypeStruct((b_pad, LANE), io_dtype),
        grid=grid,
        in_specs=[act_spec] + [w_spec] * 6 + [b_spec],
        out_specs=act_spec,
        compiler_params=pltpu.CompilerParams(
            dimension_semantics=("parallel",),    # v7x: split batch across TCs
        ),
    )(x_p, *w_pad, b_packed)

    return out[:B, :D_in].astype(x.dtype)


def init_linear(key, fan_in, fan_out):
    """Deterministic init mimicking nn.Linear default (uniform +/- 1/sqrt(fan_in)).
    Returns W already transposed to (in, out)."""
    kw, kb = jax.random.split(key)
    bound = 1.0 / jnp.sqrt(fan_in)
    w_t = jax.random.uniform(kw, (fan_in, fan_out), jnp.float32, -bound, bound)
    b = jax.random.uniform(kb, (fan_out,), jnp.float32, -bound, bound)
    return w_t, b


def reference_forward(x, params):
    a = x
    for i, (w, b) in enumerate(params):
        a = a @ w + b
        if i not in (2, 5):  # no ReLU after code layer (idx 2) or final layer (idx 5)
            a = jnp.maximum(a, 0.0)
    return a


if __name__ == "__main__":
    # cfg: ae1_input=64, ae1_hidden1=32, ae1_hidden2=16, ae1_output=8
    ae1_input, ae1_hidden1, ae1_hidden2, ae1_output = 64, 32, 16, 8
    batch = 8

    key = jax.random.PRNGKey(0)
    keys = jax.random.split(key, 7)

    dims = [(ae1_input, ae1_hidden1), (ae1_hidden1, ae1_hidden2),
            (ae1_hidden2, ae1_output), (ae1_output, ae1_hidden2),
            (ae1_hidden2, ae1_hidden1), (ae1_hidden1, ae1_input)]
    params = [init_linear(keys[i], d_in, d_out) for i, (d_in, d_out) in enumerate(dims)]

    x = jax.random.normal(keys[6], (batch, ae1_input), jnp.float32)

    out = ae1_forward(x, params)           # f32 I/O for exact comparison
    out = jax.block_until_ready(out)

    ref = reference_forward(x, params)
    assert out.shape == (batch, ae1_input)
    assert jnp.allclose(out, ref, atol=1e-4, rtol=1e-4)

    print("KERNEL_OK")
</pallas_src>

<mosaic_0001>
module attributes {stable_mosaic.version = 11 : i64} {
  func.func @ae1_kernel(%arg0: i32, %arg1: memref<8x128xf32, #tpu.memory_space<vmem>>, %arg2: memref<128x128xf32, #tpu.memory_space<vmem>>, %arg3: memref<128x128xf32, #tpu.memory_space<vmem>>, %arg4: memref<128x128xf32, #tpu.memory_space<vmem>>, %arg5: memref<128x128xf32, #tpu.memory_space<vmem>>, %arg6: memref<128x128xf32, #tpu.memory_space<vmem>>, %arg7: memref<128x128xf32, #tpu.memory_space<vmem>>, %arg8: memref<8x128xf32, #tpu.memory_space<vmem>>, %arg9: memref<8x128xf32, #tpu.memory_space<vmem>>) attributes {dimension_semantics = [#tpu.dimension_semantics<parallel>], iteration_bounds = array<i64: 1>, scalar_prefetch = 0 : i64, scratch_operands = 0 : i64, tpu.core_type = #tpu.core_type<tc>, window_params = [{transform_indices = @transform_0, window_bounds = array<i64: 8, 128>}, {pipeline_mode = #tpu.pipeline_mode<synchronous>, transform_indices = @transform_1, window_bounds = array<i64: 128, 128>}, {pipeline_mode = #tpu.pipeline_mode<synchronous>, transform_indices = @transform_2, window_bounds = array<i64: 128, 128>}, {pipeline_mode = #tpu.pipeline_mode<synchronous>, transform_indices = @transform_3, window_bounds = array<i64: 128, 128>}, {pipeline_mode = #tpu.pipeline_mode<synchronous>, transform_indices = @transform_4, window_bounds = array<i64: 128, 128>}, {pipeline_mode = #tpu.pipeline_mode<synchronous>, transform_indices = @transform_5, window_bounds = array<i64: 128, 128>}, {pipeline_mode = #tpu.pipeline_mode<synchronous>, transform_indices = @transform_6, window_bounds = array<i64: 128, 128>}, {pipeline_mode = #tpu.pipeline_mode<synchronous>, transform_indices = @transform_7, window_bounds = array<i64: 8, 128>}, {transform_indices = @transform_8, window_bounds = array<i64: 8, 128>}]} {
    %c0 = arith.constant 0 : index
    %c0_0 = arith.constant 0 : index
    %0 = vector.load %arg1[%c0, %c0_0] : memref<8x128xf32, #tpu.memory_space<vmem>>, vector<8x128xf32>
    %c0_1 = arith.constant 0 : index
    %c0_2 = arith.constant 0 : index
    %1 = vector.load %arg2[%c0_1, %c0_2] : memref<128x128xf32, #tpu.memory_space<vmem>>, vector<128x128xf32>
    %cst = arith.constant dense<0.000000e+00> : vector<8x128xf32>
    %2 = tpu.matmul %0, %1, %cst {dimension_numbers = #tpu.dot_dimension_numbers<[1], [0], [0], [1], [0, 0, 1, 1], [], []>} : vector<8x128xf32>, vector<128x128xf32>, vector<8x128xf32> -> vector<8x128xf32>
    %c0_3 = arith.constant 0 : index
    %c0_4 = arith.constant 0 : index
    %3 = vector.load %arg8[%c0_3, %c0_4] : memref<8x128xf32, #tpu.memory_space<vmem>>, vector<1x128xf32>
    %4 = vector.broadcast %3 : vector<1x128xf32> to vector<8x128xf32>
    %5 = arith.addf %2, %4 : vector<8x128xf32>
    %cst_5 = arith.constant 0.000000e+00 : f32
    %6 = vector.broadcast %cst_5 : f32 to vector<8x128xf32>
    %7 = arith.maximumf %5, %6 : vector<8x128xf32>
    %c0_6 = arith.constant 0 : index
    %c0_7 = arith.constant 0 : index
    %8 = vector.load %arg3[%c0_6, %c0_7] : memref<128x128xf32, #tpu.memory_space<vmem>>, vector<128x128xf32>
    %cst_8 = arith.constant dense<0.000000e+00> : vector<8x128xf32>
    %9 = tpu.matmul %7, %8, %cst_8 {dimension_numbers = #tpu.dot_dimension_numbers<[1], [0], [0], [1], [0, 0, 1, 1], [], []>} : vector<8x128xf32>, vector<128x128xf32>, vector<8x128xf32> -> vector<8x128xf32>
    %c1 = arith.constant 1 : index
    %c0_9 = arith.constant 0 : index
    %10 = vector.load %arg8[%c1, %c0_9] : memref<8x128xf32, #tpu.memory_space<vmem>>, vector<1x128xf32>
    %11 = vector.broadcast %10 : vector<1x128xf32> to vector<8x128xf32>
    %12 = arith.addf %9, %11 : vector<8x128xf32>
    %cst_10 = arith.constant 0.000000e+00 : f32
    %13 = vector.broadcast %cst_10 : f32 to vector<8x128xf32>
    %14 = arith.maximumf %12, %13 : vector<8x128xf32>
    %c0_11 = arith.constant 0 : index
    %c0_12 = arith.constant 0 : index
    %15 = vector.load %arg4[%c0_11, %c0_12] : memref<128x128xf32, #tpu.memory_space<vmem>>, vector<128x128xf32>
    %cst_13 = arith.constant dense<0.000000e+00> : vector<8x128xf32>
    %16 = tpu.matmul %14, %15, %cst_13 {dimension_numbers = #tpu.dot_dimension_numbers<[1], [0], [0], [1], [0, 0, 1, 1], [], []>} : vector<8x128xf32>, vector<128x128xf32>, vector<8x128xf32> -> vector<8x128xf32>
    %c2 = arith.constant 2 : index
    %c0_14 = arith.constant 0 : index
    %17 = vector.load %arg8[%c2, %c0_14] : memref<8x128xf32, #tpu.memory_space<vmem>>, vector<1x128xf32>
    %18 = vector.broadcast %17 : vector<1x128xf32> to vector<8x128xf32>
    %19 = arith.addf %16, %18 : vector<8x128xf32>
    %c0_15 = arith.constant 0 : index
    %c0_16 = arith.constant 0 : index
    %20 = vector.load %arg5[%c0_15, %c0_16] : memref<128x128xf32, #tpu.memory_space<vmem>>, vector<128x128xf32>
    %cst_17 = arith.constant dense<0.000000e+00> : vector<8x128xf32>
    %21 = tpu.matmul %19, %20, %cst_17 {dimension_numbers = #tpu.dot_dimension_numbers<[1], [0], [0], [1], [0, 0, 1, 1], [], []>} : vector<8x128xf32>, vector<128x128xf32>, vector<8x128xf32> -> vector<8x128xf32>
    %c3 = arith.constant 3 : index
    %c0_18 = arith.constant 0 : index
    %22 = vector.load %arg8[%c3, %c0_18] : memref<8x128xf32, #tpu.memory_space<vmem>>, vector<1x128xf32>
    %23 = vector.broadcast %22 : vector<1x128xf32> to vector<8x128xf32>
    %24 = arith.addf %21, %23 : vector<8x128xf32>
    %cst_19 = arith.constant 0.000000e+00 : f32
    %25 = vector.broadcast %cst_19 : f32 to vector<8x128xf32>
    %26 = arith.maximumf %24, %25 : vector<8x128xf32>
    %c0_20 = arith.constant 0 : index
    %c0_21 = arith.constant 0 : index
    %27 = vector.load %arg6[%c0_20, %c0_21] : memref<128x128xf32, #tpu.memory_space<vmem>>, vector<128x128xf32>
    %cst_22 = arith.constant dense<0.000000e+00> : vector<8x128xf32>
    %28 = tpu.matmul %26, %27, %cst_22 {dimension_numbers = #tpu.dot_dimension_numbers<[1], [0], [0], [1], [0, 0, 1, 1], [], []>} : vector<8x128xf32>, vector<128x128xf32>, vector<8x128xf32> -> vector<8x128xf32>
    %c4 = arith.constant 4 : index
    %c0_23 = arith.constant 0 : index
    %29 = vector.load %arg8[%c4, %c0_23] : memref<8x128xf32, #tpu.memory_space<vmem>>, vector<1x128xf32>
    %30 = vector.broadcast %29 : vector<1x128xf32> to vector<8x128xf32>
    %31 = arith.addf %28, %30 : vector<8x128xf32>
    %cst_24 = arith.constant 0.000000e+00 : f32
    %32 = vector.broadcast %cst_24 : f32 to vector<8x128xf32>
    %33 = arith.maximumf %31, %32 : vector<8x128xf32>
    %c0_25 = arith.constant 0 : index
    %c0_26 = arith.constant 0 : index
    %34 = vector.load %arg7[%c0_25, %c0_26] : memref<128x128xf32, #tpu.memory_space<vmem>>, vector<128x128xf32>
    %cst_27 = arith.constant dense<0.000000e+00> : vector<8x128xf32>
    %35 = tpu.matmul %33, %34, %cst_27 {dimension_numbers = #tpu.dot_dimension_numbers<[1], [0], [0], [1], [0, 0, 1, 1], [], []>} : vector<8x128xf32>, vector<128x128xf32>, vector<8x128xf32> -> vector<8x128xf32>
    %c5 = arith.constant 5 : index
    %c0_28 = arith.constant 0 : index
    %36 = vector.load %arg8[%c5, %c0_28] : memref<8x128xf32, #tpu.memory_space<vmem>>, vector<1x128xf32>
    %37 = vector.broadcast %36 : vector<1x128xf32> to vector<8x128xf32>
    %38 = arith.addf %35, %37 : vector<8x128xf32>
    %c0_29 = arith.constant 0 : index
    %c0_30 = arith.constant 0 : index
    %39 = vector.load %arg9[%c0_29, %c0_30] : memref<8x128xf32, #tpu.memory_space<vmem>>, vector<8x128xf32>
    tpu.vector_store %arg9[%c0_29, %c0_30], %38 {strides = array<i32>} : memref<8x128xf32, #tpu.memory_space<vmem>>, vector<8x128xf32>,
    return
  }
  func.func @transform_0(%arg0: i32) -> (i32, i32) {
    %c0_i32 = arith.constant 0 : i32
    %c0_i32_0 = arith.constant 0 : i32
    return %arg0, %c0_i32 : i32, i32
  }
  func.func @transform_1(%arg0: i32) -> (i32, i32) {
    %c0_i32 = arith.constant 0 : i32
    %c0_i32_0 = arith.constant 0 : i32
    %c0_i32_1 = arith.constant 0 : i32
    return %c0_i32, %c0_i32_0 : i32, i32
  }
  func.func @transform_2(%arg0: i32) -> (i32, i32) {
    %c0_i32 = arith.constant 0 : i32
    %c0_i32_0 = arith.constant 0 : i32
    %c0_i32_1 = arith.constant 0 : i32
    return %c0_i32, %c0_i32_0 : i32, i32
  }
  func.func @transform_3(%arg0: i32) -> (i32, i32) {
    %c0_i32 = arith.constant 0 : i32
    %c0_i32_0 = arith.constant 0 : i32
    %c0_i32_1 = arith.constant 0 : i32
    return %c0_i32, %c0_i32_0 : i32, i32
  }
  func.func @transform_4(%arg0: i32) -> (i32, i32) {
    %c0_i32 = arith.constant 0 : i32
    %c0_i32_0 = arith.constant 0 : i32
    %c0_i32_1 = arith.constant 0 : i32
    return %c0_i32, %c0_i32_0 : i32, i32
  }
  func.func @transform_5(%arg0: i32) -> (i32, i32) {
    %c0_i32 = arith.constant 0 : i32
    %c0_i32_0 = arith.constant 0 : i32
    %c0_i32_1 = arith.constant 0 : i32
    return %c0_i32, %c0_i32_0 : i32, i32
  }
  func.func @transform_6(%arg0: i32) -> (i32, i32) {
    %c0_i32 = arith.constant 0 : i32
    %c0_i32_0 = arith.constant 0 : i32
    %c0_i32_1 = arith.constant 0 : i32
    return %c0_i32, %c0_i32_0 : i32, i32
  }
  func.func @transform_7(%arg0: i32) -> (i32, i32) {
    %c0_i32 = arith.constant 0 : i32
    %c0_i32_0 = arith.constant 0 : i32
    %c0_i32_1 = arith.constant 0 : i32
    return %c0_i32, %c0_i32_0 : i32, i32
  }
  func.func @transform_8(%arg0: i32) -> (i32, i32) {
    %c0_i32 = arith.constant 0 : i32
    %c0_i32_0 = arith.constant 0 : i32
    return %arg0, %c0_i32 : i32, i32
  }
}

</mosaic_0001>

<bundles_post_ra>
// kernel: ae1_forward.1
= control target key start
LH: loop header
LB: loop body
LE: loop exit
PB: predicated region body
PF: predicated region fallthrough
CT: control target
= control target key end

     0   :  { %v939_v1 = vmov 0.0   ;;  %vm940_vm0 = vmmov 0   ;;  %s1407_s0 = inlined_call_operand.vmem [shape: f32[8,128], index: 0, kind: input, shape index: {}]   ;;  %s1408_s1 = inlined_call_operand.vmem [shape: f32[128,128], index: 1, kind: input, shape index: {}]   ;;  %s1409_s2 = inlined_call_operand.vmem [shape: f32[128,128], index: 2, kind: input, shape index: {}]   ;;  %s1410_s3 = inlined_call_operand.vmem [shape: f32[128,128], index: 3, kind: input, shape index: {}]   ;;  %s1411_s4 = inlined_call_operand.vmem [shape: f32[128,128], index: 4, kind: input, shape index: {}]   ;;  %s1412_s5 = inlined_call_operand.vmem [shape: f32[128,128], index: 5, kind: input, shape index: {}]   ;;  %s1413_s6 = inlined_call_operand.vmem [shape: f32[128,128], index: 6, kind: input, shape index: {}]   ;;  %s1414_s7 = inlined_call_operand.vmem [shape: f32[8,128], index: 7, kind: input, shape index: {}]   ;;  %s1415_s8 = inlined_call_operand.hbm [shape: f32[8,128], index: 8, kind: output, shape index: {}]  }
   0x1   :  { %v46_v0 = vld [vmem:[%s1408_s1 + $0x78] sm:$0xff]  ;;  %704 = vmatprep.subr.mxu0 %v939_v1  ;;  %v45_v2 = vld [vmem:[%s1408_s1 + $0x70] sm:$0xff]  ;;  %736 = vmatprep.mubr.msk.f32.mxu0 %vm940_vm0, %v939_v1  ;;  %v44_v3 = vld [vmem:[%s1408_s1 + $0x68] sm:$0xff] }
   0x2   :  { %705 = vmatpush3.msra.mxu0 %v46_v0  ;;  %739 = vmatprep.subr.mxu1 %v939_v1  ;;  %v43_v4 = vld [vmem:[%s1408_s1 + $0x60] sm:$0xff]  ;;  %v138_v5 = vld [vmem:[%s1409_s2 + $0x78] sm:$0xff]  ;;  %v137_v6 = vld [vmem:[%s1409_s2 + $0x70] sm:$0xff] }
   0x3   :  { %706 = vmatprep.subr.mxu0 %v939_v1  ;;  %771 = vmatprep.mubr.msk.f32.mxu1 %vm940_vm0, %v939_v1  ;;  %v42_v7 = vld [vmem:[%s1408_s1 + $0x58] sm:$0xff]  ;;  %v136_v8 = vld [vmem:[%s1409_s2 + $0x68] sm:$0xff]  ;;  %v41_v9 = vld [vmem:[%s1408_s1 + $0x50] sm:$0xff] }
   0x4   :  { %707 = vmatpush3.msra.mxu0 %v45_v2  ;;  %740 = vmatpush3.msra.mxu1 %v138_v5  ;;  %v135_v10 = vld [vmem:[%s1409_s2 + $0x60] sm:$0xff] }
   0x5   :  { %708 = vmatprep.subr.mxu0 %v939_v1  ;;  %741 = vmatprep.subr.mxu1 %v939_v1 }
   0x6   :  { %709 = vmatpush3.msra.mxu0 %v44_v3  ;;  %742 = vmatpush3.msra.mxu1 %v137_v6 }
   0x7   :  { %710 = vmatprep.subr.mxu0 %v939_v1  ;;  %743 = vmatprep.subr.mxu1 %v939_v1 }
   0x8   :  { %711 = vmatpush3.msra.mxu0 %v43_v4  ;;  %744 = vmatpush3.msra.mxu1 %v136_v8 }
   0x9   :  { %712 = vmatprep.subr.mxu0 %v939_v1 }
   0xa   :  { %713 = vmatpush3.msra.mxu0 %v42_v7 }
   0xb   :  { %13 = vsyncpa [#allocation3], 0  ;;  %714 = vmatprep.subr.mxu0 %v939_v1  ;;  %v40_v11 = vld [vmem:[%s1408_s1 + $0x48] sm:$0xff]  ;;  %745 = vmatprep.subr.mxu1 %v939_v1  ;;  %v134_v12 = vld [vmem:[%s1409_s2 + $0x58] sm:$0xff] }
   0xc   :  { %715 = vmatpush3.msra.mxu0 %v41_v9  ;;  %746 = vmatpush3.msra.mxu1 %v135_v10  ;;  %v39_v13 = vld [vmem:[%s1408_s1 + $0x40] sm:$0xff]  ;;  %v133_v14 = vld [vmem:[%s1409_s2 + $0x50] sm:$0xff]  ;;  %v38_v15 = vld [vmem:[%s1408_s1 + $0x38] sm:$0xff] }
   0xd   :  { %716 = vmatprep.subr.mxu0 %v939_v1  ;;  %747 = vmatprep.subr.mxu1 %v939_v1  ;;  %v132_v16 = vld [vmem:[%s1409_s2 + $0x48] sm:$0xff]  ;;  %v37_v17 = vld [vmem:[%s1408_s1 + $0x30] sm:$0xff]  ;;  %v131_v18 = vld [vmem:[%s1409_s2 + $0x40] sm:$0xff] }
   0xe   :  { %717 = vmatpush3.msra.mxu0 %v40_v11  ;;  %748 = vmatpush3.msra.mxu1 %v134_v12  ;;  %v36_v19 = vld [vmem:[%s1408_s1 + $0x28] sm:$0xff]  ;;  %v130_v20 = vld [vmem:[%s1409_s2 + $0x38] sm:$0xff]  ;;  %v35_v21 = vld [vmem:[%s1408_s1 + $0x20] sm:$0xff] }
   0xf   :  { %718 = vmatprep.subr.mxu0 %v939_v1  ;;  %749 = vmatprep.subr.mxu1 %v939_v1  ;;  %v129_v22 = vld [vmem:[%s1409_s2 + $0x30] sm:$0xff]  ;;  %v34_v23 = vld [vmem:[%s1408_s1 + $0x18] sm:$0xff]  ;;  %v128_v24 = vld [vmem:[%s1409_s2 + $0x28] sm:$0xff] }
  0x10   :  { %719 = vmatpush3.msra.mxu0 %v39_v13  ;;  %750 = vmatpush3.msra.mxu1 %v133_v14  ;;  %v33_v25 = vld [vmem:[%s1408_s1 + $0x10] sm:$0xff]  ;;  %v127_v26 = vld [vmem:[%s1409_s2 + $0x20] sm:$0xff]  ;;  %v32_v27 = vld [vmem:[%s1408_s1 + $0x8] sm:$0xff] }
  0x11   :  { %720 = vmatprep.subr.mxu0 %v939_v1  ;;  %751 = vmatprep.subr.mxu1 %v939_v1  ;;  %v126_v28 = vld [vmem:[%s1409_s2 + $0x18] sm:$0xff]  ;;  %v31_v29 = vld [vmem:[%s1408_s1] sm:$0xff]  ;;  %v125_v31 = vld [vmem:[%s1409_s2 + $0x10] sm:$0xff] }
  0x12   :  { %721 = vmatpush3.msra.mxu0 %v38_v15  ;;  %752 = vmatpush3.msra.mxu1 %v132_v16  ;;  %v30_v30 = vld [vmem:[%s1407_s0] sm:$0xff]  ;;  %v124_v32 = vld [vmem:[%s1409_s2 + $0x8] sm:$0xff]  ;;  %v230_v34 = vld [vmem:[%s1410_s3 + $0x78] sm:$0xff] }
  0x13   :  { %722 = vmatprep.subr.mxu0 %v939_v1  ;;  %753 = vmatprep.subr.mxu1 %v939_v1  ;;  %v123_v33 = vld [vmem:[%s1409_s2] sm:$0xff]  ;;  %v229_v35 = vld [vmem:[%s1410_s3 + $0x70] sm:$0xff]  ;;  %v228_v36 = vld [vmem:[%s1410_s3 + $0x68] sm:$0xff]  ;;  %s941_s2 = smov [#allocation2]  }
  0x14   :  { %723 = vmatpush3.msra.mxu0 %v37_v17  ;;  %754 = vmatpush3.msra.mxu1 %v131_v18  ;;  %v227_v37 = vld [vmem:[%s1410_s3 + $0x60] sm:$0xff]  ;;  %v226_v38 = vld [vmem:[%s1410_s3 + $0x58] sm:$0xff]  ;;  %v225_v39 = vld [vmem:[%s1410_s3 + $0x50] sm:$0xff]  ;;  %s588_s9 = sshll.u32 %s941_s2, 4  ;;  %s589_s9 = int_to_ptr.vmem [resolvable:$true] %s588_s9 }
  0x15   :  { %724 = vmatprep.subr.mxu0 %v939_v1  ;;  %755 = vmatprep.subr.mxu1 %v939_v1  ;;  %v224_v40 = vld [vmem:[%s1410_s3 + $0x48] sm:$0xff]  ;;  %v223_v41 = vld [vmem:[%s1410_s3 + $0x40] sm:$0xff]  ;;  %v222_v42 = vld [vmem:[%s1410_s3 + $0x38] sm:$0xff]  ;;  %p922_p1 = scmp.lt.s32.totalorder %s589_s9, %s589_s9 }
  0x16   :  { %725 = vmatpush3.msra.mxu0 %v36_v19  ;;  %756 = vmatpush3.msra.mxu1 %v130_v20  ;;  %v221_v43 = vld [vmem:[%s1410_s3 + $0x30] sm:$0xff]  ;;  %v220_v44 = vld [vmem:[%s1410_s3 + $0x28] sm:$0xff]  ;;  %v219_v45 = vld [vmem:[%s1410_s3 + $0x20] sm:$0xff] }
  0x17   :  { %726 = vmatprep.subr.mxu0 %v939_v1  ;;  %757 = vmatprep.subr.mxu1 %v939_v1  ;;  %v218_v46 = vld [vmem:[%s1410_s3 + $0x18] sm:$0xff]  ;;  %v596_v47 = vld [vmem:[%s1414_s7] ss:$0 sm:$0xff]  ;;  %v217_v52 = vld [vmem:[%s1410_s3 + $0x10] sm:$0xff] }
  0x18   :  { %727 = vmatpush3.msra.mxu0 %v35_v21  ;;  %758 = vmatpush3.msra.mxu1 %v129_v22  ;;  %v216_v53 = vld [vmem:[%s1410_s3 + $0x8] sm:$0xff]  ;;  %v215_v54 = vld [vmem:[%s1410_s3] sm:$0xff]  ;;  %v321_v55 = vld [vmem:[%s1411_s4 + $0x78] sm:$0xff] }
  0x19   :  { %728 = vmatprep.subr.mxu0 %v939_v1  ;;  %759 = vmatprep.subr.mxu1 %v939_v1  ;;  %v320_v56 = vld [vmem:[%s1411_s4 + $0x70] sm:$0xff]  ;;  %v319_v57 = vld [vmem:[%s1411_s4 + $0x68] sm:$0xff]  ;;  %v318_v58 = vld [vmem:[%s1411_s4 + $0x60] sm:$0xff] }
  0x1a   :  { %729 = vmatpush3.msra.mxu0 %v34_v23  ;;  %760 = vmatpush3.msra.mxu1 %v128_v24  ;;  %v317_v59 = vld [vmem:[%s1411_s4 + $0x58] sm:$0xff]  ;;  %v316_v60 = vld [vmem:[%s1411_s4 + $0x50] sm:$0xff]  ;;  %v315_v61 = vld [vmem:[%s1411_s4 + $0x48] sm:$0xff] }
  0x1b   :  { %730 = vmatprep.subr.mxu0 %v939_v1  ;;  %761 = vmatprep.subr.mxu1 %v939_v1  ;;  %v314_v62 = vld [vmem:[%s1411_s4 + $0x40] sm:$0xff]  ;;  %v313_v63 = vld [vmem:[%s1411_s4 + $0x38] sm:$0xff]  ;;  %v312_v0 = vld [vmem:[%s1411_s4 + $0x30] sm:$0xff] }
  0x1c   :  { %731 = vmatpush3.msra.mxu0 %v33_v25  ;;  %762 = vmatpush3.msra.mxu1 %v127_v26  ;;  %v311_v2 = vld [vmem:[%s1411_s4 + $0x28] sm:$0xff]  ;;  %v310_v3 = vld [vmem:[%s1411_s4 + $0x20] sm:$0xff]  ;;  %v309_v4 = vld [vmem:[%s1411_s4 + $0x18] sm:$0xff] }
  0x1d   :  { %732 = vmatprep.subr.mxu0 %v939_v1  ;;  %763 = vmatprep.subr.mxu1 %v939_v1  ;;  %v308_v5 = vld [vmem:[%s1411_s4 + $0x10] sm:$0xff]  ;;  %v597_v6 = vld [vmem:[%s1414_s7 + $0x1] ss:$0 sm:$0xff]  ;;  %v307_v11 = vld [vmem:[%s1411_s4 + $0x8] sm:$0xff] }
  0x1e   :  { %733 = vmatpush3.msra.mxu0 %v32_v27  ;;  %764 = vmatpush3.msra.mxu1 %v126_v28  ;;  %v306_v12 = vld [vmem:[%s1411_s4] sm:$0xff]  ;;  %v413_v13 = vld [vmem:[%s1412_s5 + $0x78] sm:$0xff]  ;;  %v412_v14 = vld [vmem:[%s1412_s5 + $0x70] sm:$0xff] }
  0x1f   :  { %734 = vmatprep.subr.mxu0 %v939_v1  ;;  %765 = vmatprep.subr.mxu1 %v939_v1  ;;  %v411_v15 = vld [vmem:[%s1412_s5 + $0x68] sm:$0xff]  ;;  %v410_v16 = vld [vmem:[%s1412_s5 + $0x60] sm:$0xff]  ;;  %v409_v17 = vld [vmem:[%s1412_s5 + $0x58] sm:$0xff] }
  0x20   :  { %735 = vmatpush3.msra.mxu0 %v31_v29  ;;  %766 = vmatpush3.msra.mxu1 %v125_v31  ;;  %v408_v18 = vld [vmem:[%s1412_s5 + $0x50] sm:$0xff]  ;;  %v407_v19 = vld [vmem:[%s1412_s5 + $0x48] sm:$0xff]  ;;  %v406_v20 = vld [vmem:[%s1412_s5 + $0x40] sm:$0xff] }
  0x21   :  { %737 = vmatmul.mubr.f32.vlgmr.msra.gmra.mxu0 %v30_v30  ;;  %774 = vmatprep.subr.mxu0 %v939_v1  ;;  %v405_v21 = vld [vmem:[%s1412_s5 + $0x38] sm:$0xff]  ;;  %v404_v22 = vld [vmem:[%s1412_s5 + $0x30] sm:$0xff]  ;;  %v403_v23 = vld [vmem:[%s1412_s5 + $0x28] sm:$0xff] }
  0x22   :  { %806 = vmatprep.mubr.msk.f32.mxu0 %vm940_vm0, %v939_v1  ;;  %767 = vmatprep.subr.mxu1 %v939_v1  ;;  %v402_v24 = vld [vmem:[%s1412_s5 + $0x20] sm:$0xff]  ;;  %v401_v25 = vld [vmem:[%s1412_s5 + $0x18] sm:$0xff]  ;;  %v400_v30 = vld [vmem:[%s1412_s5 + $0x10] sm:$0xff] }
  0x23   :  { %768 = vmatpush3.msra.mxu1 %v124_v32  ;;  %775 = vmatpush3.msra.mxu0 %v230_v34  ;;  %v598_v26 = vld [vmem:[%s1414_s7 + $0x2] ss:$0 sm:$0xff]  ;;  %v399_v31 = vld [vmem:[%s1412_s5 + $0x8] sm:$0xff]  ;;  %v504_v34 = vld [vmem:[%s1413_s6 + $0x70] sm:$0xff] }
  0x24   :  { %769 = vmatprep.subr.mxu1 %v939_v1  ;;  %776 = vmatprep.subr.mxu0 %v939_v1  ;;  %v398_v32 = vld [vmem:[%s1412_s5] sm:$0xff] }
  0x25   :  { %770 = vmatpush3.msra.mxu1 %v123_v33  ;;  %777 = vmatpush3.msra.mxu0 %v229_v35  ;;  %v505_v33 = vld [vmem:[%s1413_s6 + $0x78] sm:$0xff]  ;;  %v503_v35 = vld [vmem:[%s1413_s6 + $0x68] sm:$0xff] }
  0x26   :  { %809 = vmatprep.subr.mxu1 %v939_v1  ;;  %778 = vmatprep.subr.mxu0 %v939_v1 }
  0x27   :  { %779 = vmatpush3.msra.mxu0 %v228_v36  ;;  %v502_v36 = vld [vmem:[%s1413_s6 + $0x60] sm:$0xff] }
  0x28   :  { %780 = vmatprep.subr.mxu0 %v939_v1 }
  0x29   :  { %781 = vmatpush3.msra.mxu0 %v227_v37  ;;  %v501_v37 = vld [vmem:[%s1413_s6 + $0x58] sm:$0xff] }
  0x2a   :  { %782 = vmatprep.subr.mxu0 %v939_v1 }
  0x2b   :  { %783 = vmatpush3.msra.mxu0 %v226_v38  ;;  %v500_v38 = vld [vmem:[%s1413_s6 + $0x50] sm:$0xff] }
  0x2c   :  { %784 = vmatprep.subr.mxu0 %v939_v1 }
  0x2d   :  { %785 = vmatpush3.msra.mxu0 %v225_v39  ;;  %v499_v39 = vld [vmem:[%s1413_s6 + $0x48] sm:$0xff] }
  0x2e   :  { %786 = vmatprep.subr.mxu0 %v939_v1 }
  0x2f   :  { %787 = vmatpush3.msra.mxu0 %v224_v40  ;;  %v498_v40 = vld [vmem:[%s1413_s6 + $0x40] sm:$0xff] }
  0x30   :  { %788 = vmatprep.subr.mxu0 %v939_v1 }
  0x31   :  { %789 = vmatpush3.msra.mxu0 %v223_v41  ;;  %v497_v41 = vld [vmem:[%s1413_s6 + $0x38] sm:$0xff] }
  0x32   :  { %790 = vmatprep.subr.mxu0 %v939_v1 }
  0x33   :  { %791 = vmatpush3.msra.mxu0 %v222_v42  ;;  %v496_v42 = vld [vmem:[%s1413_s6 + $0x30] sm:$0xff] }
  0x34   :  { %792 = vmatprep.subr.mxu0 %v939_v1 }
  0x35   :  { %793 = vmatpush3.msra.mxu0 %v221_v43  ;;  %v495_v43 = vld [vmem:[%s1413_s6 + $0x28] sm:$0xff] }
  0x36   :  { %794 = vmatprep.subr.mxu0 %v939_v1 }
  0x37   :  { %795 = vmatpush3.msra.mxu0 %v220_v44  ;;  %v494_v44 = vld [vmem:[%s1413_s6 + $0x20] sm:$0xff] }
  0x38   :  { %796 = vmatprep.subr.mxu0 %v939_v1 }
  0x39   :  { %797 = vmatpush3.msra.mxu0 %v219_v45  ;;  %v493_v45 = vld [vmem:[%s1413_s6 + $0x18] sm:$0xff] }
  0x3a   :  { %798 = vmatprep.subr.mxu0 %v939_v1 }
  0x3b   :  { %799 = vmatpush3.msra.mxu0 %v218_v46  ;;  %v599_v46 = vld [vmem:[%s1414_s7 + $0x3] ss:$0 sm:$0xff] }
  0x3c   :  { %800 = vmatprep.subr.mxu0 %v939_v1 }
  0x3d   :  { %801 = vmatpush3.msra.mxu0 %v217_v52  ;;  %v491_v52 = vld [vmem:[%s1413_s6 + $0x8] sm:$0xff] }
  0x3e   :  { %802 = vmatprep.subr.mxu0 %v939_v1 }
  0x3f   :  { %803 = vmatpush3.msra.mxu0 %v216_v53  ;;  %v490_v53 = vld [vmem:[%s1413_s6] sm:$0xff] }
  0x40   :  { %804 = vmatprep.subr.mxu0 %v939_v1 }
  0x41   :  { %805 = vmatpush3.msra.mxu0 %v215_v54  ;;  %v600_v54 = vld [vmem:[%s1414_s7 + $0x4] ss:$0 sm:$0xff] }
  0x42   :  { %844 = vmatprep.subr.mxu0 %v939_v1 }
  0xe1   :  { %v118_v48 = vpop.f32.mrf.mxu0 }
  0xe2   :  { %v119_v49 = vadd.f32 %v596_v47, %v118_v48 }
  0xe3   :  { %v738_v50 = vpop.f32.mrf.mxu0 }
  0xe4   :  { %v122_v51 = vmax.f32 %v119_v49, 0.0 }
  0xe6   :  { %772 = vmatmul.mubr.f32.vlgmr.msra.gmra.mxu1 %v122_v51  ;;  %v492_v51 = vld [vmem:[%s1413_s6 + $0x10] sm:$0xff]  ;;  %s917_s6 = scalar_lea.vmem %s589_s9, 128 }
  0xe7   :  { %841 = vmatprep.mubr.msk.f32.mxu1 %vm940_vm0, %v939_v1  ;;  %810 = vmatpush3.msra.mxu1 %v321_v55  ;;  %p918_p0 = scmp.ne.s32.totalorder %s589_s9, %s917_s6  ;;  %p923_p2 = scmp.lt.s32.totalorder %s917_s6, %s917_s6 }
  0xe8   :  { %811 = vmatprep.subr.mxu1 %v939_v1 }
  0xe9   :  { %812 = vmatpush3.msra.mxu1 %v320_v56  ;;  %p924_p3 = por %p923_p2, %p922_p1 }
  0xea   :  { %813 = vmatprep.subr.mxu1 %v939_v1 }
  0xeb   :  { %814 = vmatpush3.msra.mxu1 %v319_v57  ;;  %p925_p4 = pnand %p924_p3, %p918_p0 }
  0xec   :  { %815 = vmatprep.subr.mxu1 %v939_v1 }
  0xed   :  { %816 = vmatpush3.msra.mxu1 %v318_v58 }
  0xee   :  { %817 = vmatprep.subr.mxu1 %v939_v1 }
  0xef   :  { %818 = vmatpush3.msra.mxu1 %v317_v59  ;;  %v601_v59 = vld [vmem:[%s1414_s7 + $0x5] ss:$0 sm:$0xff] }
  0xf0   :  { %819 = vmatprep.subr.mxu1 %v939_v1 }
  0xf1   :  { %820 = vmatpush3.msra.mxu1 %v316_v60 }
  0xf2   :  { %821 = vmatprep.subr.mxu1 %v939_v1 }
  0xf3   :  { %822 = vmatpush3.msra.mxu1 %v315_v61 }
  0xf4   :  { %823 = vmatprep.subr.mxu1 %v939_v1 }
  0xf5   :  { %824 = vmatpush3.msra.mxu1 %v314_v62 }
  0xf6   :  { %825 = vmatprep.subr.mxu1 %v939_v1 }
  0xf7   :  { %826 = vmatpush3.msra.mxu1 %v313_v63 }
  0xf8   :  { %827 = vmatprep.subr.mxu1 %v939_v1 }
  0xf9   :  { %828 = vmatpush3.msra.mxu1 %v312_v0 }
  0xfa   :  { %829 = vmatprep.subr.mxu1 %v939_v1 }
  0xfb   :  { %830 = vmatpush3.msra.mxu1 %v311_v2 }
  0xfc   :  { %831 = vmatprep.subr.mxu1 %v939_v1 }
  0xfd   :  { %832 = vmatpush3.msra.mxu1 %v310_v3 }
  0xfe   :  { %833 = vmatprep.subr.mxu1 %v939_v1 }
  0xff   :  { %834 = vmatpush3.msra.mxu1 %v309_v4 }
 0x100   :  { %835 = vmatprep.subr.mxu1 %v939_v1 }
 0x101   :  { %836 = vmatpush3.msra.mxu1 %v308_v5 }
 0x102   :  { %837 = vmatprep.subr.mxu1 %v939_v1 }
 0x103   :  { %838 = vmatpush3.msra.mxu1 %v307_v11 }
 0x104   :  { %839 = vmatprep.subr.mxu1 %v939_v1 }
 0x105   :  { %840 = vmatpush3.msra.mxu1 %v306_v12 }
 0x106   :  { %879 = vmatprep.subr.mxu1 %v939_v1 }
 0x1a6   :  { %v210_v7 = vpop.f32.mrf.mxu1 }
 0x1a7   :  { %v211_v8 = vadd.f32 %v597_v6, %v210_v7 }
 0x1a8   :  { %v773_v9 = vpop.f32.mrf.mxu1 }
 0x1a9   :  { %v214_v10 = vmax.f32 %v211_v8, 0.0 }
 0x1ab   :  { %807 = vmatmul.mubr.f32.vlgmr.msra.gmra.mxu0 %v214_v10 }
 0x1ac   :  { %876 = vmatprep.mubr.msk.f32.mxu0 %vm940_vm0, %v939_v1  ;;  %845 = vmatpush3.msra.mxu0 %v413_v13 }
 0x1ad   :  { %846 = vmatprep.subr.mxu0 %v939_v1 }
 0x1ae   :  { %847 = vmatpush3.msra.mxu0 %v412_v14 }
 0x1af   :  { %848 = vmatprep.subr.mxu0 %v939_v1 }
 0x1b0   :  { %849 = vmatpush3.msra.mxu0 %v411_v15 }
 0x1b1   :  { %850 = vmatprep.subr.mxu0 %v939_v1 }
 0x1b2   :  { %851 = vmatpush3.msra.mxu0 %v410_v16 }
 0x1b3   :  { %852 = vmatprep.subr.mxu0 %v939_v1 }
 0x1b4   :  { %853 = vmatpush3.msra.mxu0 %v409_v17 }
 0x1b5   :  { %854 = vmatprep.subr.mxu0 %v939_v1 }
 0x1b6   :  { %855 = vmatpush3.msra.mxu0 %v408_v18 }
 0x1b7   :  { %856 = vmatprep.subr.mxu0 %v939_v1 }
 0x1b8   :  { %857 = vmatpush3.msra.mxu0 %v407_v19 }
 0x1b9   :  { %858 = vmatprep.subr.mxu0 %v939_v1 }
 0x1ba   :  { %859 = vmatpush3.msra.mxu0 %v406_v20 }
 0x1bb   :  { %860 = vmatprep.subr.mxu0 %v939_v1 }
 0x1bc   :  { %861 = vmatpush3.msra.mxu0 %v405_v21 }
 0x1bd   :  { %862 = vmatprep.subr.mxu0 %v939_v1 }
 0x1be   :  { %863 = vmatpush3.msra.mxu0 %v404_v22 }
 0x1bf   :  { %864 = vmatprep.subr.mxu0 %v939_v1 }
 0x1c0   :  { %865 = vmatpush3.msra.mxu0 %v403_v23 }
 0x1c1   :  { %866 = vmatprep.subr.mxu0 %v939_v1 }
 0x1c2   :  { %867 = vmatpush3.msra.mxu0 %v402_v24 }
 0x1c3   :  { %868 = vmatprep.subr.mxu0 %v939_v1 }
 0x1c4   :  { %869 = vmatpush3.msra.mxu0 %v401_v25 }
 0x1c5   :  { %870 = vmatprep.subr.mxu0 %v939_v1 }
 0x1c6   :  { %871 = vmatpush3.msra.mxu0 %v400_v30 }
 0x1c7   :  { %872 = vmatprep.subr.mxu0 %v939_v1 }
 0x1c8   :  { %873 = vmatpush3.msra.mxu0 %v399_v31 }
 0x1c9   :  { %874 = vmatprep.subr.mxu0 %v939_v1 }
 0x1ca   :  { %875 = vmatpush3.msra.mxu0 %v398_v32 }
 0x26b   :  { %v302_v27 = vpop.f32.mrf.mxu0 }
 0x26c   :  { %v303_v28 = vadd.f32 %v598_v26, %v302_v27 }
 0x26d   :  { %v808_v29 = vpop.f32.mrf.mxu0 }
 0x26e   :  { %842 = vmatmul.mubr.f32.vlgmr.msra.gmra.mxu1 %v303_v28 }
 0x26f   :  { %911 = vmatprep.mubr.msk.f32.mxu1 %vm940_vm0, %v939_v1  ;;  %880 = vmatpush3.msra.mxu1 %v505_v33 }
 0x270   :  { %881 = vmatprep.subr.mxu1 %v939_v1 }
 0x271   :  { %882 = vmatpush3.msra.mxu1 %v504_v34 }
 0x272   :  { %883 = vmatprep.subr.mxu1 %v939_v1 }
 0x273   :  { %884 = vmatpush3.msra.mxu1 %v503_v35 }
 0x274   :  { %885 = vmatprep.subr.mxu1 %v939_v1 }
 0x275   :  { %886 = vmatpush3.msra.mxu1 %v502_v36 }
 0x276   :  { %887 = vmatprep.subr.mxu1 %v939_v1 }
 0x277   :  { %888 = vmatpush3.msra.mxu1 %v501_v37 }
 0x278   :  { %889 = vmatprep.subr.mxu1 %v939_v1 }
 0x279   :  { %890 = vmatpush3.msra.mxu1 %v500_v38 }
 0x27a   :  { %891 = vmatprep.subr.mxu1 %v939_v1 }
 0x27b   :  { %892 = vmatpush3.msra.mxu1 %v499_v39 }
 0x27c   :  { %893 = vmatprep.subr.mxu1 %v939_v1 }
 0x27d   :  { %894 = vmatpush3.msra.mxu1 %v498_v40 }
 0x27e   :  { %895 = vmatprep.subr.mxu1 %v939_v1 }
 0x27f   :  { %896 = vmatpush3.msra.mxu1 %v497_v41 }
 0x280   :  { %897 = vmatprep.subr.mxu1 %v939_v1 }
 0x281   :  { %898 = vmatpush3.msra.mxu1 %v496_v42 }
 0x282   :  { %899 = vmatprep.subr.mxu1 %v939_v1 }
 0x283   :  { %900 = vmatpush3.msra.mxu1 %v495_v43 }
 0x284   :  { %901 = vmatprep.subr.mxu1 %v939_v1 }
 0x285   :  { %902 = vmatpush3.msra.mxu1 %v494_v44 }
 0x286   :  { %903 = vmatprep.subr.mxu1 %v939_v1 }
 0x287   :  { %904 = vmatpush3.msra.mxu1 %v493_v45 }
 0x288   :  { %905 = vmatprep.subr.mxu1 %v939_v1 }
 0x289   :  { %906 = vmatpush3.msra.mxu1 %v492_v51 }
 0x28a   :  { %907 = vmatprep.subr.mxu1 %v939_v1 }
 0x28b   :  { %908 = vmatpush3.msra.mxu1 %v491_v52 }
 0x28c   :  { %909 = vmatprep.subr.mxu1 %v939_v1 }
 0x28d   :  { %910 = vmatpush3.msra.mxu1 %v490_v53 }
 0x32e   :  { %v393_v47 = vpop.f32.mrf.mxu1 }
 0x32f   :  { %v394_v48 = vadd.f32 %v599_v46, %v393_v47 }
 0x330   :  { %v843_v49 = vpop.f32.mrf.mxu1 }
 0x331   :  { %v397_v50 = vmax.f32 %v394_v48, 0.0 }
 0x333   :  { %877 = vmatmul.mubr.f32.vlgmr.msra.gmra.mxu0 %v397_v50 }
 0x3f3   :  { %v485_v55 = vpop.f32.mrf.mxu0 }
 0x3f4   :  { %v486_v56 = vadd.f32 %v600_v54, %v485_v55 }
 0x3f5   :  { %v878_v57 = vpop.f32.mrf.mxu0 }
 0x3f6   :  { %v489_v58 = vmax.f32 %v486_v56, 0.0 }
 0x3f8   :  { %912 = vmatmul.mubr.f32.vlgmr.msra.gmra.mxu1 %v489_v58 }
 0x4b8   :  { %v577_v1 = vpop.f32.mrf.mxu1 }
 0x4b9   :  { %v578_v60 = vadd.f32 %v601_v59, %v577_v1 }
 0x4ba   :  { %v913_v61 = vpop.f32.mrf.mxu1 }
 0x4bb   :  { %581 = vst [vmem:[#allocation2] sm:$0xff] %v578_v60 }
 0x4bc   :  { %928 = shalt.err (!%p925_p4)
}
 0x4bd   :  { %591 = dma.vmem_to_hbm [thread:$0]  %s589_s9, 128, %s1415_s8, [#allocation3]  }
 0x4be   :  { %937 = dma.done.wait [#allocation3], 128  }
 0x4bf   :  { %938 = vsyncadd [#allocation3], 4294967168 }
 0x4c0   :  { %595 = vsyncpa [#allocation3], 1 }

</bundles_post_ra>
